<compile_context>
chip_gen: v5e
topology: v5e:2x2
jax: 0.10.0
libtpu: 0.0.40
codegen_flags: <defaults>
</compile_context>

<pallas_src>
import functools

import numpy as np
import jax
import jax.numpy as jnp
from jax.experimental import pallas as pl
from jax.experimental.pallas import tpu as pltpu


# ----------------------- sincos position embeddings (numpy) -----------------------
def get_1d_sincos_pos_embed_from_grid(embed_dim, pos):
    omega = np.arange(embed_dim // 2, dtype=np.float64)
    omega /= embed_dim / 2.0
    omega = 1.0 / 10000 ** omega
    pos = np.asarray(pos, dtype=np.float64).reshape(-1)
    out = np.einsum("m,d->md", pos, omega)
    return np.concatenate([np.sin(out), np.cos(out)], axis=1)


def get_2d_sincos_pos_embed_from_grid(embed_dim, grid):
    emb_h = get_1d_sincos_pos_embed_from_grid(embed_dim // 2, grid[0])
    emb_w = get_1d_sincos_pos_embed_from_grid(embed_dim // 2, grid[1])
    return np.concatenate([emb_h, emb_w], axis=1)


def get_2d_sincos_pos_embed(embed_dim, grid_size, base_size=(16, 16),
                            interpolation_scale=(1.0, 1.0)):
    grid_h = (np.arange(grid_size[0], dtype=np.float32)
              / (grid_size[0] / base_size[0]) / interpolation_scale[0])
    grid_w = (np.arange(grid_size[1], dtype=np.float32)
              / (grid_size[1] / base_size[1]) / interpolation_scale[1])
    grid = np.meshgrid(grid_w, grid_h)  # w goes first
    grid = np.stack(grid, axis=0)
    grid = grid.reshape([2, 1, grid_size[1], grid_size[0]])
    return get_2d_sincos_pos_embed_from_grid(embed_dim, grid)  # (H*W, E)


def get_1d_sincos_pos_embed(embed_dim, grid_size, base_size=16, interpolation_scale=1.0):
    pos = (np.arange(0, grid_size, dtype=np.float32)
           / (grid_size / base_size) / interpolation_scale)
    return get_1d_sincos_pos_embed_from_grid(embed_dim, pos)  # (T, E)


# --------------------------------- tile selection ---------------------------------
def _vmem_budget_and_target_rows():
    """Generation-aware VMEM budget / tile-row target.

    v5e/v6e have 128 MiB physical VMEM -> bigger (~1024-row) tiles and a higher
    limit; v7x (and unknown chips) have 64 MiB -> stay near 512 rows with a
    conservative limit.
    """
    kind = ""
    try:
        kind = jax.devices()[0].device_kind.lower()
    except Exception:
        pass
    if ("v5" in kind) or ("v6" in kind):
        return 100 * 1024 * 1024, 1024
    return 56 * 1024 * 1024, 512


def _pick_tiles(bt, n, k, e, out_itemsize, target_rows, vmem_budget):
    """Pick (tile_bt, tile_n) so each grid step sees ~target_rows patch rows.

    Invariants (needed so the in-kernel flatten of (tb, tn, K) -> (tb*tn, K)
    is a free, layout-preserving reshape):
      * tile_bt divides bt, tile_n divides n,
      * tile_bt > 1 only when tile_n == n and n % 8 == 0,
      * tile_n is a multiple of 8 or tile_n == n.
    Row count is also capped so double-buffered x/out/pos streams stay well
    inside the per-generation VMEM budget.
    """
    # double-buffered bytes per patch row: x (bf16) + out + pos (bf16)
    bytes_per_row = 2 * (k * 2 + e * out_itemsize + e * 2)
    max_rows = max(8, (vmem_budget // 2) // max(bytes_per_row, 1))
    target = max(8, min(target_rows, (max_rows // 8) * 8))

    if n > target:
        t = (target // 8) * 8
        while t >= 8:
            if n % t == 0:
                return 1, t
            t -= 8
        # awkward N (no multiple-of-8 divisor <= target): take the full row block.
        # TODO(synk): a cdiv grid + masked tail would keep tiles small for such N.
        return 1, n
    if n % 8 != 0:
        return 1, n          # cannot group frames safely; N is small anyway
    tb = max(1, min(bt, target // max(n, 1), 64))
    while tb > 1 and bt % tb != 0:
        tb -= 1
    return tb, n


def _ensure_two_grid_steps(bt, n, tb, tn):
    """Split the tile if the grid would only have one step, so both v7x
    TensorCores get work and the DMA/compute pipeline has something to overlap."""
    if (bt // tb) * (n // tn) >= 2:
        return tb, tn
    if tb > 1:
        for cand in range(tb // 2, 0, -1):
            if bt % cand == 0:
                return cand, tn
    for cand in range(tn // 2, 0, -1):          # tb == 1 here
        if n % cand == 0 and cand % 8 == 0:
            return tb, cand
    return tb, tn                                # genuinely a 1-step workload


# ----------------------------------- Pallas kernel -----------------------------------
def _patch_embed_kernel(*refs, layer_norm, eps):
    # layer_norm=True : refs = (x, w, b, pos, tpe, out)
    # layer_norm=False: refs = (x, w, pos, tpe, out)   (bias pre-folded into tpe)
    # x:   (tb, tn, K)  bf16 patches (tb frames x tn patches)
    # w:   (K, E)       bf16 projection weight (Conv2d reshaped)
    # b:   (1, E)       f32 conv bias (only when layer_norm; applied before LN)
    # pos: (tn, E)      bf16 2D sincos pos-embed tile
    # tpe: (tb, 1, E)   f32 per-frame temporal sincos pos-embed (+ bias if !LN)
    # out: (tb, tn, E)
    if layer_norm:
        x_ref, w_ref, b_ref, pos_ref, tpe_ref, o_ref = refs
    else:
        x_ref, w_ref, pos_ref, tpe_ref, o_ref = refs
        b_ref = None
    tb, tn, kdim = x_ref.shape
    e = w_ref.shape[1]

    # One MXU matmul per grid step: flatten all patch rows in the block.
    # Free reshape: tile selection guarantees tb == 1 or tn % 8 == 0.
    x = x_ref[...].reshape(tb * tn, kdim)
    y = jnp.dot(x, w_ref[...], preferred_element_type=jnp.float32)      # (tb*tn, E) f32

    if layer_norm:
        y = y + b_ref[...]                                               # bias precedes LN
        # two-pass variance for numerical robustness (elementwise_affine=False)
        mean = jnp.mean(y, axis=-1, keepdims=True)
        yc = y - mean
        var = jnp.mean(yc * yc, axis=-1, keepdims=True)
        y = yc * jax.lax.rsqrt(var + eps)

    y = y.reshape(tb, tn, e)
    y = y + pos_ref[...].astype(jnp.float32)[None] + tpe_ref[...]
    o_ref[...] = y.astype(o_ref.dtype)


# ----------------------------------- module wrapper -----------------------------------
class VideoPatchEmbed2D:
    """2D Image to Patch Embedding with 3D (2D spatial + 1D temporal) position embedding."""

    def __init__(self, num_frames=1, height=224, width=224, patch_size_t=1, patch_size=16,
                 in_channels=3, embed_dim=768, layer_norm=False, flatten=True, bias=True,
                 interpolation_scale=(1, 1), interpolation_scale_t=1, use_abs_pos=True,
                 eps=1e-06, key=None):
        if patch_size_t != 1:
            raise ValueError("patch_size_t must be 1 in VideoPatchEmbed2D")
        if not flatten:
            # TODO(synk): flatten=False path (returning NCHW feature maps) not supported.
            raise NotImplementedError("flatten=False is not supported")
        self.use_abs_pos = use_abs_pos
        self.flatten = flatten
        self.layer_norm = layer_norm
        self.eps = float(eps)
        self.patch_size_t = patch_size_t
        self.patch_size = patch_size
        self.in_channels = in_channels
        self.embed_dim = embed_dim

        # Deterministic Conv2d parameter init (PyTorch default: U(-1/sqrt(fan_in), +1/sqrt(fan_in)))
        key = jax.random.PRNGKey(0) if key is None else key
        kw, kb = jax.random.split(key)
        fan_in = in_channels * patch_size * patch_size
        bound = 1.0 / np.sqrt(fan_in)
        self.proj_weight = jax.random.uniform(
            kw, (embed_dim, in_channels, patch_size, patch_size),
            dtype=jnp.float32, minval=-bound, maxval=bound)
        if bias:
            self.proj_bias = jax.random.uniform(
                kb, (embed_dim,), dtype=jnp.float32, minval=-bound, maxval=bound)
        else:
            self.proj_bias = jnp.zeros((embed_dim,), jnp.float32)

        self.height, self.width = height // patch_size, width // patch_size
        self.base_size = (height // patch_size, width // patch_size)
        self.interpolation_scale = (interpolation_scale[0], interpolation_scale[1])
        pos = get_2d_sincos_pos_embed(embed_dim, (self.height, self.width),
                                      base_size=self.base_size,
                                      interpolation_scale=self.interpolation_scale)
        self.pos_embed = jnp.asarray(pos, jnp.float32)                 # (H*W, E)

        self.num_frames = ((num_frames - 1) // patch_size_t + 1
                           if num_frames % 2 == 1 else num_frames // patch_size_t)
        self.base_size_t = self.num_frames
        self.interpolation_scale_t = interpolation_scale_t
        tpe = get_1d_sincos_pos_embed(embed_dim, self.num_frames,
                                      base_size=self.base_size_t,
                                      interpolation_scale=self.interpolation_scale_t)
        self.temp_pos_embed = jnp.asarray(tpe, jnp.float32)            # (num_frames, E)

    def __call__(self, latent, num_frames, output_dtype=None):
        # NOTE: num_frames (and latent's static shape) must be Python-static,
        # mirroring the original module's Python-level branches.
        num_frames = int(num_frames)
        B, C, T, H, W = latent.shape
        P = self.patch_size
        hp, wp = H // P, W // P
        N, K, E = hp * wp, C * P * P, self.embed_dim
        BT = B * T
        # Module semantics: output dtype == latent dtype (override with bf16 if
        # downstream accepts it — halves the largest HBM stream).
        out_dtype = np.dtype(latent.dtype if output_dtype is None else output_dtype)
        compute_dtype = jnp.bfloat16

        # --- patchify: b c t h w -> (b t) (hp wp) (c p p), staged in bf16 ---
        # TODO(synk): this XLA staging copy (~= kernel input traffic) could be removed
        # by BlockSpec-ing the raw NCTHW latent and doing the (c,ph,pw) unfold in-kernel;
        # kept as a bf16 XLA reshape for lowering safety.
        x = latent.astype(compute_dtype)
        x = jnp.transpose(x, (0, 2, 1, 3, 4)).reshape(BT, C, hp, P, wp, P)
        x = jnp.transpose(x, (0, 2, 4, 1, 3, 5))                        # (BT, hp, wp, C, P, P)
        patches = x.reshape(BT, N, K)                                   # bf16

        w = self.proj_weight.reshape(E, K).T.astype(compute_dtype)      # (K, E) bf16
        b = self.proj_bias.reshape(1, E).astype(jnp.float32)            # (1, E) f32

        # --- position embeddings (recomputed if resolution / frame count differs) ---
        if self.use_abs_pos:
            if (self.height, self.width) != (hp, wp):
                pos = jnp.asarray(get_2d_sincos_pos_embed(
                    E, (hp, wp), base_size=self.base_size,
                    interpolation_scale=self.interpolation_scale), jnp.float32)
            else:
                pos = self.pos_embed
            if self.num_frames != num_frames:
                tpe = jnp.asarray(get_1d_sincos_pos_embed(
                    E, num_frames, base_size=self.base_size_t,
                    interpolation_scale=self.interpolation_scale_t), jnp.float32)
            else:
                tpe = self.temp_pos_embed
            # video frame t < num_frames gets tpe[t]; trailing image frames get tpe[0]
            idx = np.where(np.arange(T) < num_frames, np.arange(T), 0)
            tpe_t = tpe[idx][:, None, :]                                # (T, 1, E)
        else:
            pos = jnp.zeros((N, E), jnp.float32)
            tpe_t = jnp.zeros((T, 1, E), jnp.float32)

        # pos table streamed in bf16 (halves its DMA bytes; error << bf16 matmul floor)
        pos_bf16 = pos.astype(jnp.bfloat16)                             # (N, E) bf16
        tpe_bt = jnp.tile(tpe_t, (B, 1, 1)).astype(jnp.float32)         # (BT, 1, E) f32
        if not self.layer_norm:
            # fold the conv bias into the tiny per-frame additive term (bias must
            # precede LN, so keep it separate in the layer_norm case)
            tpe_bt = tpe_bt + b[None]

        vmem_budget, target_rows = _vmem_budget_and_target_rows()
        tile_bt, tile_n = _pick_tiles(BT, N, K, E, out_dtype.itemsize,
                                      target_rows, vmem_budget)
        tile_bt, tile_n = _ensure_two_grid_steps(BT, N, tile_bt, tile_n)
        # Grid order (N-blocks, BT-blocks): BT is the fast inner axis, so the pos
        # table and the (K,E) weight keep a constant block index across it and are
        # DMA'd only once per outer step.
        grid = (N // tile_n, BT // tile_bt)

        kernel = functools.partial(_patch_embed_kernel,
                                   layer_norm=self.layer_norm, eps=self.eps)

        in_arrays = [patches, w]
        in_specs = [
            pl.BlockSpec((tile_bt, tile_n, K), lambda nt, g: (g, nt, 0)),
            pl.BlockSpec((K, E), lambda nt, g: (0, 0)),
        ]
        if self.layer_norm:
            in_arrays.append(b)
            in_specs.append(pl.BlockSpec((1, E), lambda nt, g: (0, 0)))
        in_arrays += [pos_bf16, tpe_bt]
        in_specs += [
            pl.BlockSpec((tile_n, E), lambda nt, g: (nt, 0)),
            pl.BlockSpec((tile_bt, 1, E), lambda nt, g: (g, 0, 0)),
        ]

        # Right-size the VMEM limit from the actual double-buffered footprint
        # (keeps headroom, capped below the smallest supported chip's physical VMEM).
        fp = 2 * (tile_bt * tile_n * K * 2)                 # x (bf16)
        fp += 2 * (K * E * 2)                               # weight (bf16)
        fp += 2 * (tile_n * E * 2)                          # pos (bf16)
        fp += 2 * (tile_bt * E * 4)                         # tpe (f32)
        fp += 2 * (tile_bt * tile_n * E * out_dtype.itemsize)
        if self.layer_norm:
            fp += 2 * (E * 4)
        vmem_limit = int(min(vmem_budget, max(32 * 1024 * 1024, 2 * fp)))

        cost = pl.CostEstimate(
            flops=2 * BT * N * K * E,
            transcendentals=BT * N if self.layer_norm else 0,
            bytes_accessed=(patches.size * 2 + w.size * 2 + pos_bf16.size * 2
                            + tpe_bt.size * 4 * (N // tile_n)
                            + (b.size * 4 if self.layer_norm else 0)
                            + BT * N * E * out_dtype.itemsize))

        out = pl.pallas_call(
            kernel,
            out_shape=jax.ShapeDtypeStruct((BT, N, E), out_dtype),
            grid_spec=pltpu.PrefetchScalarGridSpec(
                num_scalar_prefetch=0,
                grid=grid,
                in_specs=in_specs,
                out_specs=pl.BlockSpec((tile_bt, tile_n, E),
                                       lambda nt, g: (g, nt, 0)),
            ),
            compiler_params=pltpu.CompilerParams(
                dimension_semantics=("parallel", "parallel"),
                vmem_limit_bytes=vmem_limit),
            cost_estimate=cost,
        )(*in_arrays)                                                   # (BT, N, E)

        out = out.reshape(B, T, N, E)
        video_latent = out[:, :num_frames]
        image_latent = out[:, num_frames:]
        video_latent = (video_latent.reshape(B, num_frames * N, E)
                        if video_latent.size > 0 else None)
        image_latent = (image_latent.reshape(B * (T - num_frames), N, E)
                        if image_latent.size > 0 else None)
        if num_frames == 1 and image_latent is None:
            image_latent = video_latent
            video_latent = None
        return video_latent, image_latent


# ----------------------------------------- main -----------------------------------------
if __name__ == "__main__":
    def patchify_ref(lat, Pp):
        Bb, Cc, Tt, Hh, Ww = lat.shape
        hp_, wp_ = Hh // Pp, Ww // Pp
        xb = jnp.transpose(lat.astype(jnp.bfloat16), (0, 2, 1, 3, 4))
        xb = xb.reshape(Bb, Tt, Cc, hp_, Pp, wp_, Pp)
        xb = jnp.transpose(xb, (0, 1, 3, 5, 2, 4, 6))
        return xb.reshape(Bb, Tt, hp_ * wp_, Cc * Pp * Pp)

    # ---- config 1: no LayerNorm (bias folded into temporal pos term) ----
    # batch=2, channels=4, frames=2, spatial=32, patch=8 -> N=16, K=256, E=128
    B, C, T, H, W = 2, 4, 2, 32, 32
    P, E = 8, 128
    module = VideoPatchEmbed2D(
        num_frames=T, height=H, width=W, patch_size=P, in_channels=C,
        embed_dim=E, layer_norm=False, bias=True, key=jax.random.PRNGKey(1))
    latent = jax.random.normal(jax.random.PRNGKey(0), (B, C, T, H, W), dtype=jnp.float32)

    video_latent, image_latent = module(latent, num_frames=T)
    jax.block_until_ready(video_latent)

    xb = patchify_ref(latent, P)
    wb = module.proj_weight.reshape(E, C * P * P).T.astype(jnp.bfloat16)
    ref = jnp.einsum("btnk,ke->btne", xb, wb, preferred_element_type=jnp.float32)
    ref = ref + module.proj_bias[None, None, None, :]
    ref = ref + module.pos_embed[None, None]
    ref = ref + module.temp_pos_embed[None, :, None, :]
    ref = ref.reshape(B, T * (H // P) * (W // P), E)
    np.testing.assert_allclose(np.asarray(video_latent), np.asarray(ref),
                               rtol=2e-2, atol=2e-2)
    assert image_latent is None

    # ---- config 2: LayerNorm path (elementwise_affine=False, as in the module) ----
    B2, C2, T2, H2, W2 = 1, 4, 3, 16, 16
    P2, E2 = 8, 128
    mod2 = VideoPatchEmbed2D(
        num_frames=T2, height=H2, width=W2, patch_size=P2, in_channels=C2,
        embed_dim=E2, layer_norm=True, bias=True, key=jax.random.PRNGKey(2))
    lat2 = jax.random.normal(jax.random.PRNGKey(3), (B2, C2, T2, H2, W2), dtype=jnp.float32)

    vid2, img2 = mod2(lat2, num_frames=T2)
    jax.block_until_ready(vid2)

    xb2 = patchify_ref(lat2, P2)
    wb2 = mod2.proj_weight.reshape(E2, C2 * P2 * P2).T.astype(jnp.bfloat16)
    y2 = jnp.einsum("btnk,ke->btne", xb2, wb2, preferred_element_type=jnp.float32)
    y2 = y2 + mod2.proj_bias[None, None, None, :]
    mean2 = jnp.mean(y2, axis=-1, keepdims=True)
    var2 = jnp.mean((y2 - mean2) ** 2, axis=-1, keepdims=True)
    y2 = (y2 - mean2) * jax.lax.rsqrt(var2 + mod2.eps)
    y2 = y2 + mod2.pos_embed[None, None] + mod2.temp_pos_embed[None, :, None, :]
    ref2 = y2.reshape(B2, T2 * (H2 // P2) * (W2 // P2), E2)
    np.testing.assert_allclose(np.asarray(vid2), np.asarray(ref2),
                               rtol=2e-2, atol=2e-2)
    assert img2 is None

    print("KERNEL_OK")
</pallas_src>

<mosaic_0001>
module attributes {stable_mosaic.version = 11 : i64} {
  func.func @_patch_embed_kernel(%arg0: i32, %arg1: i32, %arg2: memref<2x16x256xbf16, #tpu.memory_space<vmem>>, %arg3: memref<256x128xbf16, #tpu.memory_space<vmem>>, %arg4: memref<16x128xbf16, #tpu.memory_space<vmem>>, %arg5: memref<2x1x128xf32, #tpu.memory_space<vmem>>, %arg6: memref<2x16x128xf32, #tpu.memory_space<vmem>>) attributes {dimension_semantics = [#tpu.dimension_semantics<parallel>, #tpu.dimension_semantics<parallel>], iteration_bounds = array<i64: 1, 2>, scalar_prefetch = 0 : i64, scratch_operands = 0 : i64, tpu.core_type = #tpu.core_type<tc>, window_params = [{transform_indices = @transform_0, window_bounds = array<i64: 2, 16, 256>}, {pipeline_mode = #tpu.pipeline_mode<synchronous>, transform_indices = @transform_1, window_bounds = array<i64: 256, 128>}, {transform_indices = @transform_2, window_bounds = array<i64: 16, 128>}, {transform_indices = @transform_3, window_bounds = array<i64: 2, 1, 128>}, {transform_indices = @transform_4, window_bounds = array<i64: 2, 16, 128>}]} {
    %c0 = arith.constant 0 : index
    %c0_0 = arith.constant 0 : index
    %c0_1 = arith.constant 0 : index
    %0 = vector.load %arg2[%c0, %c0_0, %c0_1] : memref<2x16x256xbf16, #tpu.memory_space<vmem>>, vector<2x16x256xbf16>
    %1 = vector.shape_cast %0 : vector<2x16x256xbf16> to vector<32x256xbf16>
    %c0_2 = arith.constant 0 : index
    %c0_3 = arith.constant 0 : index
    %2 = vector.load %arg3[%c0_2, %c0_3] : memref<256x128xbf16, #tpu.memory_space<vmem>>, vector<256x128xbf16>
    %cst = arith.constant dense<0.000000e+00> : vector<32x128xf32>
    %3 = tpu.matmul %1, %2, %cst {dimension_numbers = #tpu.dot_dimension_numbers<[1], [0], [0], [1], [0, 0, 1, 1], [], []>} : vector<32x256xbf16>, vector<256x128xbf16>, vector<32x128xf32> -> vector<32x128xf32>
    %4 = vector.shape_cast %3 : vector<32x128xf32> to vector<2x16x128xf32>
    %c0_4 = arith.constant 0 : index
    %c0_5 = arith.constant 0 : index
    %5 = vector.load %arg4[%c0_4, %c0_5] : memref<16x128xbf16, #tpu.memory_space<vmem>>, vector<16x128xbf16>
    %6 = arith.extf %5 : vector<16x128xbf16> to vector<16x128xf32>
    %7 = vector.shape_cast %6 : vector<16x128xf32> to vector<1x16x128xf32>
    %8 = vector.broadcast %7 : vector<1x16x128xf32> to vector<2x16x128xf32>
    %9 = arith.addf %4, %8 : vector<2x16x128xf32>
    %c0_6 = arith.constant 0 : index
    %c0_7 = arith.constant 0 : index
    %c0_8 = arith.constant 0 : index
    %10 = vector.load %arg5[%c0_6, %c0_7, %c0_8] : memref<2x1x128xf32, #tpu.memory_space<vmem>>, vector<2x1x128xf32>
    %11 = vector.broadcast %10 : vector<2x1x128xf32> to vector<2x16x128xf32>
    %12 = arith.addf %9, %11 : vector<2x16x128xf32>
    %c0_9 = arith.constant 0 : index
    %c0_10 = arith.constant 0 : index
    %c0_11 = arith.constant 0 : index
    %13 = vector.load %arg6[%c0_9, %c0_10, %c0_11] : memref<2x16x128xf32, #tpu.memory_space<vmem>>, vector<2x16x128xf32>
    tpu.vector_store %arg6[%c0_9, %c0_10, %c0_11], %12 {strides = array<i32>} : memref<2x16x128xf32, #tpu.memory_space<vmem>>, vector<2x16x128xf32>,
    return
  }
  func.func @transform_0(%arg0: i32, %arg1: i32) -> (i32, i32, i32) {
    %c0_i32 = arith.constant 0 : i32
    %c0_i32_0 = arith.constant 0 : i32
    return %arg1, %arg0, %c0_i32 : i32, i32, i32
  }
  func.func @transform_1(%arg0: i32, %arg1: i32) -> (i32, i32) {
    %c0_i32 = arith.constant 0 : i32
    %c0_i32_0 = arith.constant 0 : i32
    %c0_i32_1 = arith.constant 0 : i32
    return %c0_i32, %c0_i32_0 : i32, i32
  }
  func.func @transform_2(%arg0: i32, %arg1: i32) -> (i32, i32) {
    %c0_i32 = arith.constant 0 : i32
    %c0_i32_0 = arith.constant 0 : i32
    return %arg0, %c0_i32 : i32, i32
  }
  func.func @transform_3(%arg0: i32, %arg1: i32) -> (i32, i32, i32) {
    %c0_i32 = arith.constant 0 : i32
    %c0_i32_0 = arith.constant 0 : i32
    %c0_i32_1 = arith.constant 0 : i32
    return %arg1, %c0_i32, %c0_i32_0 : i32, i32, i32
  }
  func.func @transform_4(%arg0: i32, %arg1: i32) -> (i32, i32, i32) {
    %c0_i32 = arith.constant 0 : i32
    %c0_i32_0 = arith.constant 0 : i32
    return %arg1, %arg0, %c0_i32 : i32, i32, i32
  }
}

</mosaic_0001>

<bundles_post_ra>
// kernel: tpu_custom_call.1
= control target key start
LH: loop header
LB: loop body
LE: loop exit
PB: predicated region body
PF: predicated region fallthrough
CT: control target
= control target key end

     0   :  { %s1379_s0 = inlined_call_operand.hbm [shape: bf16[4,16,256], index: 0, kind: input, shape index: {}]   ;;  %s1380_s1 = inlined_call_operand.hbm [shape: bf16[256,128], index: 1, kind: input, shape index: {}]   ;;  %s1381_s2 = inlined_call_operand.hbm [shape: bf16[16,128], index: 2, kind: input, shape index: {}]   ;;  %s1382_s3 = inlined_call_operand.hbm [shape: f32[4,1,128], index: 3, kind: input, shape index: {}]   ;;  %s1383_s4 = inlined_call_operand.hbm [shape: f32[4,16,128], index: 4, kind: output, shape index: {}]  }
   0x1   :  { %1385 = sst [smem:[#allocation17_spill]] %s1379_s0 }
   0x2   :  { %1386 = sst [smem:[#allocation18_spill]] %s1380_s1 }
   0x3   :  { %1387 = sst [smem:[#allocation19_spill]] %s1381_s2 }
   0x4   :  { %9 = vsyncpa [#allocation3], 0 }
   0x5   :  { %11 = vsyncpa [#allocation3 + $0x1], 0 }
   0x6   :  { %12 = vsyncpa [#allocation6], 0 }
   0x7   :  { %13 = vsyncpa [#allocation9], 0 }
   0x8   :  { %15 = vsyncpa [#allocation9 + $0x1], 0 }
   0x9   :  { %16 = vsyncpa [#allocation4], 0 }
   0xa   :  { %18 = vsyncpa [#allocation4 + $0x1], 0  ;;  %s1183_s15 = smov 0   ;;  %s1185_s16 = smov 0  }
   0xb   :  { %s1187_s17 = smov 0   ;;  %s1189_s18 = smov 0  }
   0xc   :  { %s1191_s19 = smov 0   ;;  %s1193_s20 = smov 0  }
   0xd LB: > { %s690_s21 = sadd.s32 4294967295, %s1146_s20   ;;  %s691_s22 = sadd.s32 4294967294, %s1146_s20   ;;  %s1146_s20 = sphi %s1193_s20, %s24_s20   ;;  %s1142_s19 = sphi %s1191_s19, %s1407_s19   ;;  %s1138_s18 = sphi %s1189_s18, %s1406_s18   ;;  %s1134_s17 = sphi %s1187_s17, %s1405_s17   ;;  %s1130_s16 = sphi %s1185_s16, %s1404_s16   ;;  %s1126_s15 = sphi %s1183_s15, %s1403_s15  }
   0xe   : > { %p58_p0 = scmp.ne.s32.totalorder %s1130_s16, %s1126_s15  ;;  %p1217_p1 = scmp.eq.s32.totalorder %s690_s21, 0 }
   0xf   : > { %p1221_p2 = scmp.eq.s32.totalorder %s690_s21, 1  ;;  %p163_p3 = scmp.eq.s32.totalorder %s691_s22, 1 }
  0x10   : > { %p1227_p4 = por %p1217_p1, %p58_p0  ;;  %p692_p5 = scmp.ge.s32.totalorder %s1146_s20, 1 }
  0x11   : > { %p1232_p6 = por %p163_p3, %p58_p0  ;;  %p170_p7 = scmp.lt.s32.totalorder %s1146_s20, 3 }
  0x12   : > { %s1392_s1 = sld [smem:[#allocation18_spill]]  ;;  %s1148_s5 = smov [#allocation5]  }
  0x13   : > { %p1240_p8 = pnand %p692_p5, %p170_p7  ;;  %s183_s6 = sshll.u32 %s1148_s5, 4  ;;  %s184_s6 = int_to_ptr.vmem [resolvable:$true] %s183_s6 }
  0x14   : > { %p695_p11 = scmp.ge.s32.totalorder %s1146_s20, 2  ;;  %s1394_s2 = sld [smem:[#allocation19_spill]] }
  0x15   : > { %p852_p9 = pneg %p1240_p8  ;;  %s1149_s10 = smov 64  }
  0x16   : > { %s1150_s11 = smov 4   ;;  %s1151_s12 = smov [#allocation7]  }
  0x17   : > { %p853_p10 = pnand %p852_p9, %p1217_p1  ;;  %s200_s13 = sshll.u32 %s1151_s12, 4  ;;  %s201_s13 = int_to_ptr.vmem [resolvable:$true] %s200_s13 }
  0x18   : > { %s181_s29 = sshll.u32 %s1392_s1, 4  ;;  %s33_s14 = sadd.s32 1, %s1142_s19  ;;  %s182_s29 = int_to_ptr.hbm [resolvable:$true] %s181_s29 }
  0x19   : > { %855 = dma.hbm_to_vmem [thread:$0]  (!%p853_p10), %s182_s29, 2048, %s184_s6, [#allocation6], %s1149_s10, %s1149_s10, %s1150_s11  }
  0x1a   : > { %s198_s9 = sshll.u32 %s1394_s2, 4  ;;  %s45_s21 = sadd.s32 1, %s1134_s17  ;;  %s199_s9 = int_to_ptr.hbm [resolvable:$true] %s198_s9 }
  0x1b   : > { %858 = dma.hbm_to_vmem [thread:$0]  (!%p853_p10), %s199_s9, 128, %s201_s13, [#allocation6], %s1149_s10, %s1149_s10, %s1150_s11  }
  0x1c   : > { %p34_p12 = scmp.ge.s32.totalorder %s33_s14, 2  ;;  %p52_p13 = scmp.ne.s32.totalorder %s1134_s17, %s1130_s16 }
  0x1d   : > { %p53_p0 = scmp.eq.s32.totalorder %s1146_s20, 0  ;;  %p872_p3 = scmp.lt.s32.totalorder %s1146_s20, 2 }
  0x1e   : > { %s1409_s14 = smov (%p34_p12, %s33_s14), 0  ;;  %p1266_p7 = por %p1221_p2, %p52_p13 }
  0x1f   : > { %1395 = sst [smem:[#allocation15_spill]] %s1409_s14  ;;  %p1260_p5 = por %p53_p0, %p52_p13 }
  0x20   : > { %s40_s28 = ssub.s32 %s1142_s19, %s1409_s14  ;;  %s1273_s29 = sand.u32 1, %s1134_s17  }
  0x21   : > { %p43_p9 = scmp.eq.s32.totalorder %s40_s28, 0  ;;  %s696_s5 = sshll.u32 %s1273_s29, 5 }
  0x22   : > { %s795_s6 = sshll.u32 %s1142_s19, 5  ;;  %s1399_s0 = sld [smem:[#allocation17_spill]] }
  0x23   : > { %s1278_s7 = scalar_select %p43_p9, %s1134_s17, %s45_s21  }
  0x24   : > { %s218_s11 = scalar_lea.vmem [#allocation2], %s696_s5  ;;  %p1287_p2 = pnand %p872_p3, %p1260_p5 }
  0x25   : > { %1398 = sst [smem:[#allocation16_spill]] %s1278_s7  ;;  %s230_s12 = sshll.u32 %s218_s11, 4  ;;  %s231_s12 = int_to_ptr.vmem [resolvable:$true] %s230_s12 }
  0x26   : > { %s700_s21 = sshll.u32 %s1273_s29, 1  ;;  %s215_s28 = scalar_lea.sflag [#allocation3], %s1273_s29 }
  0x27   : > { %s1152_s1 = smov 128   ;;  %s1153_s2 = smov 8  }
  0x28   : > { %s227_s24 = scalar_lea.hbm %s1399_s0, %s795_s6  ;;  %s701_s6 = sshll.u32 %s1142_s19, 1 }
  0x29   : > { %s228_s10 = sshll.u32 %s227_s24, 4  ;;  %s248_s9 = scalar_lea.hbm %s1382_s3, %s701_s6  ;;  %s229_s10 = int_to_ptr.hbm [resolvable:$true] %s228_s10 }
  0x2a   : > { %862 = dma.hbm_to_vmem [thread:$0]  (!%p1287_p2), %s229_s10, 512, %s231_s12, %s215_s28, %s1152_s1, %s1152_s1, %s1153_s2  }
  0x2b   : > { %s244_s24 = scalar_lea.vmem [#allocation8], %s700_s21  ;;  %s249_s11 = sshll.u32 %s248_s9, 4  ;;  %s250_s11 = int_to_ptr.hbm [resolvable:$true] %s249_s11 }
  0x2c   : > { %s251_s22 = sshll.u32 %s244_s24, 4  ;;  %s241_s0 = scalar_lea.sflag [#allocation9], %s1273_s29  ;;  %s252_s22 = int_to_ptr.vmem [resolvable:$true] %s251_s22 }
  0x2d   : > { %s1154_s14 = smov 16   ;;  %s1155_s7 = smov 1  }
  0x2e   : > { %865 = dma.hbm_to_vmem [thread:$0]  (!%p1287_p2), %s250_s11, 32, %s252_s22, %s241_s0, %s1154_s14, %s1154_s14, %s1155_s7  }
  0x2f   : > { %263 = sbr.rel (%p1240_p8) target bundleno = 241 (0xf1), region = 36  ;;  %s1305_s1 = sand.u32 (!%p1240_p8), 1, %s1130_s16  }
  0x30   : > { %s703_s2 = sshll.u32 (!%p1240_p8), %s1305_s1, 5  ;;  %s266_s10 = scalar_lea.sflag (!%p1240_p8), [#allocation3], %s1305_s1 }
  0x31   : > { %s1311_s12 = scalar_lea.vmem (!%p1240_p8), [#allocation2], %s703_s2 }
  0x34   : > { %1109 = dma.done.wait (%p1227_p4), %s266_s10, 512  }
  0x35   : > { %1111 = vsyncadd (%p1227_p4), %s266_s10, 4294966784 }
  0x36   : > { %1113 = dma.done.wait (%p1217_p1), [#allocation6], 2176  }
  0x37   : > { %1115 = vsyncadd (%p1217_p1), [#allocation6], 4294965120  ;;  %s706_s0 = sshll.u32 %s1305_s1, 1  ;;  %s286_s30 = scalar_lea.sflag [#allocation9], %s1305_s1 }
  0x38   : > { %s1323_s14 = scalar_lea.vmem [#allocation8], %s706_s0 }
  0x39   : > { %1117 = dma.done.wait (%p1227_p4), %s286_s30, 32  }
  0x3a   : > { %1119 = vsyncadd (%p1227_p4), %s286_s30, 4294967264  ;;  %v807_v0 = vld [vmem:[#allocation5 + $0x38] sm:$0xff]  ;;  %v806_v2 = vld [vmem:[#allocation5 + $0x30] sm:$0xff]  ;;  %s319_s23 = scalar_lea.vmem [#allocation10], %s703_s2  ;;  %s817_s25 = sshll.u32 %s1138_s18, 5 }
  0x3b   : > { %v815_v1 = vld [vmem:[#allocation5 + $0x78] sm:$0xff]  ;;  %478 = vmatpush.bf16.msra.mxu0 %v807_v0  ;;  %822 = vmatpush.bf16.msra.mxu2 %v807_v0  ;;  %v814_v3 = vld [vmem:[#allocation5 + $0x70] sm:$0xff]  ;;  %v805_v4 = vld [vmem:[#allocation5 + $0x28] sm:$0xff]  ;;  %s555_s13 = scalar_lea.hbm %s1383_s4, %s817_s25  ;;  %s556_s21 = sshll.u32 %s319_s23, 4  ;;  %s557_s21 = int_to_ptr.vmem [resolvable:$true] %s556_s21 }
  0x3c   : > { %497 = vmatpush.bf16.msra.mxu1 %v815_v1  ;;  %830 = vmatpush.bf16.msra.mxu3 %v815_v1  ;;  %v813_v5 = vld [vmem:[#allocation5 + $0x68] sm:$0xff]  ;;  %v804_v6 = vld [vmem:[#allocation5 + $0x20] sm:$0xff]  ;;  %v803_v8 = vld [vmem:[#allocation5 + $0x18] sm:$0xff]  ;;  %s558_s28 = sshll.u32 %s555_s13, 4  ;;  %s541_s18 = scalar_lea.sflag [#allocation4], %s1305_s1  ;;  %s559_s28 = int_to_ptr.hbm [resolvable:$true] %s558_s28 }
  0x3d   : > { %v812_v7 = vld [vmem:[#allocation5 + $0x60] sm:$0xff]  ;;  %v811_v9 = vld [vmem:[#allocation5 + $0x58] sm:$0xff]  ;;  %v802_v10 = vld [vmem:[#allocation5 + $0x10] sm:$0xff]  ;;  %s1070_s6 = sshra.s32 %s559_s28, 4  ;;  %s1076_s24 = scalar_lea.hbm %s1383_s4, 64  ;;  %s1071_s6 = int_to_ptr.hbm [resolvable:$true] %s1070_s6 }
  0x3e   : > { %v810_v11 = vld [vmem:[#allocation5 + $0x50] sm:$0xff]  ;;  %v801_v12 = vld [vmem:[#allocation5 + $0x8] sm:$0xff]  ;;  %v800_v14 = vld [vmem:[#allocation5] sm:$0xff]  ;;  %s1072_s5 = scalar_lea.hbm %s1071_s6, 32  ;;  %p1077_p10 = scmp.lt.s32.totalorder %s1071_s6, %s1383_s4 }
  0x3f   : > { %479 = vmatpush.bf16.msra.mxu0 %v806_v2  ;;  %823 = vmatpush.bf16.msra.mxu2 %v806_v2  ;;  %v809_v13 = vld [vmem:[#allocation5 + $0x48] sm:$0xff]  ;;  %v808_v15 = vld [vmem:[#allocation5 + $0x40] sm:$0xff]  ;;  %v718_v18 = vld [vmem:[%s1311_s12 + $0x10] sm:$0xf]  ;;  %p1073_p1 = scmp.ne.s32.totalorder %s1071_s6, %s1072_s5  ;;  %p1078_p12 = scmp.lt.s32.totalorder %s1076_s24, %s1072_s5 }
  0x40   : > { %498 = vmatpush.bf16.msra.mxu1 %v814_v3  ;;  %831 = vmatpush.bf16.msra.mxu3 %v814_v3  ;;  %v710_v16 = vld [vmem:[%s1311_s12] sm:$0xf]  ;;  %v797_v17 = vld [vmem:[%s1311_s12 + $0x4] sm:$0xf0]  ;;  %v799_v19 = vld [vmem:[%s1311_s12 + $0x14] sm:$0xf0] }
  0x41   : > { %v796_v20 = vld [vmem:[%s1311_s12 + $0x4] sm:$0xf]  ;;  %v712_v21 = vld [vmem:[%s1311_s12 + $0x8] sm:$0xf0]  ;;  %v798_v22 = vld [vmem:[%s1311_s12 + $0x14] sm:$0xf]  ;;  %v711_v24 = vor.u32 %v797_v17, %v710_v16  ;;  %v719_v25 = vor.u32 %v799_v19, %v718_v18  ;;  %p1074_p4 = pnand %p1073_p1, %p1266_p7  ;;  %p1079_p13 = por %p1078_p12, %p1077_p10 }
  0x42   : > { %v720_v23 = vld [vmem:[%s1311_s12 + $0x18] sm:$0xf0]  ;;  %v715_v26 = vor.u32 %v796_v20, %v712_v21  ;;  %v819_v28 = vld [vmem:[#allocation7] sm:$0xff]   ;;  %v934_v33 = vld [vmem:[%s1323_s14] ss:$0 sm:$0xff] }
  0x43   : > { %480 = vmatpush.bf16.msra.mxu0 %v805_v4  ;;  %824 = vmatpush.bf16.msra.mxu2 %v805_v4  ;;  %v723_v27 = vor.u32 %v798_v22, %v720_v23  ;;  %v820_v30 = vunpack.c.l.bf16 %v819_v28  ;;  %v935_v39 = vld [vmem:[%s1323_s14 + $0x1] ss:$0 sm:$0xff]  ;;  %v821_v41 = vunpack.c.h.bf16 %v819_v28  ;;  %p1075_p8 = pneg %p1074_p4 }
  0x44   : > { %499 = vmatpush.bf16.msra.mxu1 %v813_v5  ;;  %832 = vmatpush.bf16.msra.mxu3 %v813_v5 }
  0x45   : > { %p1080_p0 = pnand %p1079_p13, %p1075_p8 }
  0x47   : > { %481 = vmatpush.bf16.msra.mxu0 %v804_v6  ;;  %825 = vmatpush.bf16.msra.mxu2 %v804_v6 }
  0x48   : > { %500 = vmatpush.bf16.msra.mxu1 %v812_v7  ;;  %833 = vmatpush.bf16.msra.mxu3 %v812_v7 }
  0x4b   : > { %482 = vmatpush.bf16.msra.mxu0 %v803_v8  ;;  %826 = vmatpush.bf16.msra.mxu2 %v803_v8 }
  0x4c   : > { %501 = vmatpush.bf16.msra.mxu1 %v811_v9  ;;  %834 = vmatpush.bf16.msra.mxu3 %v811_v9 }
  0x4f   : > { %483 = vmatpush.bf16.msra.mxu0 %v802_v10  ;;  %827 = vmatpush.bf16.msra.mxu2 %v802_v10 }
  0x50   : > { %502 = vmatpush.bf16.msra.mxu1 %v810_v11  ;;  %835 = vmatpush.bf16.msra.mxu3 %v810_v11 }
  0x53   : > { %484 = vmatpush.bf16.msra.mxu0 %v801_v12  ;;  %828 = vmatpush.bf16.msra.mxu2 %v801_v12 }
  0x54   : > { %503 = vmatpush.bf16.msra.mxu1 %v809_v13  ;;  %836 = vmatpush.bf16.msra.mxu3 %v809_v13 }
  0x57   : > { %485 = vmatpush.bf16.msra.mxu0 %v800_v14  ;;  %829 = vmatpush.bf16.msra.mxu2 %v800_v14 }
  0x58   : > { %504 = vmatpush.bf16.msra.mxu1 %v808_v15  ;;  %837 = vmatpush.bf16.msra.mxu3 %v808_v15 }
  0x5a   : > { %486 = vmatmul.bf16.vlgmr.msra.gmra.mxu0 %v711_v24  ;;  %491 = vmatmul.bf16.vlgmr.msra.gmra.mxu2 %v719_v25 }
  0x5b   : > { %505 = vmatmul.bf16.vlgmr.msra.gmra.mxu1 %v715_v26  ;;  %510 = vmatmul.bf16.vlgmr.msra.gmra.mxu3 %v723_v27 }
  0xd7   : > { %v487_v29 = vpop.f32.mrf.mxu0 }
  0xd8   : > { %v506_v31 = vpop.f32.mrf.mxu1 }
  0xd9   : > { %v507_v32 = vadd.f32 %v506_v31, %v487_v29 }
  0xdb   : > { %v520_v34 = vadd.f32 %v820_v30, %v507_v32 }
  0xdd   : > { %v532_v35 = vadd.f32 %v934_v33, %v520_v34  ;;  %v492_v36 = vpop.f32.mrf.mxu2 }
  0xde   : > { %v511_v37 = vpop.f32.mrf.mxu3 }
  0xdf   : > { %536 = vst [vmem:[%s319_s23] sm:$0xff] %v532_v35  ;;  %v512_v38 = vadd.f32 %v511_v37, %v492_v36  ;;  %v489_v40 = vpop.f32.mrf.mxu0 }
  0xe0   : > { %v508_v42 = vpop.f32.mrf.mxu1 }
  0xe1   : > { %v522_v43 = vadd.f32 %v820_v30, %v512_v38  ;;  %v509_v44 = vadd.f32 %v508_v42, %v489_v40 }
  0xe3   : > { %v534_v45 = vadd.f32 %v935_v39, %v522_v43  ;;  %v521_v46 = vadd.f32 %v821_v41, %v509_v44 }
  0xe5   : > { %538 = vst [vmem:[%s319_s23 + $0x10] sm:$0xff] %v534_v45  ;;  %v533_v47 = vadd.f32 %v934_v33, %v521_v46  ;;  %v494_v48 = vpop.f32.mrf.mxu2 }
  0xe6   : > { %v513_v49 = vpop.f32.mrf.mxu3 }
  0xe7   : > { %537 = vst [vmem:[%s319_s23 + $0x8] sm:$0xff] %v533_v47  ;;  %v514_v50 = vadd.f32 %v513_v49, %v494_v48 }
  0xe9   : > { %v523_v51 = vadd.f32 %v821_v41, %v514_v50 }
  0xeb   : > { %v535_v52 = vadd.f32 %v935_v39, %v523_v51 }
  0xed   : > { %539 = vst [vmem:[%s319_s23 + $0x18] sm:$0xff] %v535_v52 }
  0xee   : > { %1083 = shalt.err (!%p1080_p0)
}
  0xef   : > { %s1156_s1 = smov 128   ;;  %s1157_s2 = smov 8  }
  0xf0   : > { %850 = dma.vmem_to_hbm [thread:$0]  (%p1266_p7), %s557_s21, 512, %s559_s28, %s541_s18, %s1156_s1, %s1156_s1, %s1157_s2  }
  0xf1 PF: > { %s573_s10 = sand.u32 1, %s1126_s15   ;;  %p867_p3 = pnand %p695_p11, %p1232_p6 }
  0xf2   : > { %s574_s12 = scalar_lea.sflag [#allocation4], %s573_s10 }
  0xf3   : > { %p868_p5 = pneg %p867_p3 }
  0xf5   : > { %1121 = dma.done.wait (%p868_p5), %s574_s12, 512  }
  0xf6   : > { %1123 = vsyncadd (%p868_p5), %s574_s12, 4294966784  ;;  %s24_s20 = sadd.s32 1, %s1146_s20   ;;  %s1401_s0 = sld [smem:[#allocation16_spill]] }
  0xf7   : > { %p21_p9 = scmp.ge.s32.totalorder %s24_s20, 4   ;;  %s1402_s27 = sld [smem:[#allocation15_spill]] }
  0xf8   : > { %s1403_s15 = smov %s1130_s16  ;;  %s1404_s16 = smov %s1134_s17 }
  0xf9   : > { %s1406_s18 = smov %s1142_s19  ;;  %23 = sbr.rel (!%p21_p9) target bundleno = 13 (0xd), region = 103 }
  0xfc   : > { %s1405_s17 = smov %s1401_s0 }
  0xfd   : > { %s1407_s19 = smov %s1402_s27 }
  0xfe   :  { %580 = vsyncpa [#allocation3], 1 }
  0xff   :  { %582 = vsyncpa [#allocation3 + $0x1], 1 }
 0x100   :  { %583 = vsyncpa [#allocation6], 1 }
 0x101   :  { %584 = vsyncpa [#allocation9], 1 }
 0x102   :  { %586 = vsyncpa [#allocation9 + $0x1], 1 }
 0x103   :  { %587 = vsyncpa [#allocation4], 1 }
 0x104   :  { %589 = vsyncpa [#allocation4 + $0x1], 1 }

</bundles_post_ra>
